<compile_context>
chip_gen: v6e
topology: v6e:2x2x1
jax: 0.10.0
libtpu: 0.0.40
codegen_flags: <defaults>
</compile_context>

<pallas_src>
import math

import jax
import jax.numpy as jnp
from jax.experimental import pallas as pl
from jax.experimental.pallas import tpu as pltpu


# ----------------------------- Pallas kernel ------------------------------

def _pe_add_kernel(x_ref, pe_ref, o_ref):
    # x_ref: (tb, tc), pe_ref: (1, tc) -> broadcast-add over rows.
    o_ref[...] = (x_ref[...] + pe_ref[...]).astype(o_ref.dtype)


# ------------------------------ tile policy --------------------------------

def _round_up(x, m):
    return ((x + m - 1) // m) * m


def _tile_plan(B, n, itemsize):
    """Fixed, VMEM-budgeted tile sizes for a (B, n) memory-bound add."""
    # Sub-32-bit dtypes pack along sublanes: keep the row tile a multiple of
    # the packed sublane count so stores stay unmasked.
    sub = {4: 8, 2: 16, 1: 32}.get(itemsize, 8)

    tb = min(256, _round_up(B, sub))                 # row (sublane) tile
    tc = min(2048, _round_up(n, 128))                # lane tile, multiple of 128

    # v7x has 2 TensorCores sharded over "parallel" grid axes: make sure at
    # least 2 blocks exist along some parallel axis when possible.
    while pl.cdiv(B, tb) * pl.cdiv(n, tc) < 2 and tc > 128:
        tc = max(128, _round_up(tc // 2, 128))

    # Explicit VMEM budget: double-buffered x + out blocks plus the resident
    # (double-buffered) PE row must stay comfortably under every chip's
    # default scoped-VMEM limit.
    budget = 12 * 1024 * 1024

    def footprint(tb_, tc_):
        return 4 * tb_ * tc_ * itemsize + 2 * tc_ * itemsize

    while footprint(tb, tc) > budget and tb > sub:
        tb = max(sub, tb // 2)
    while footprint(tb, tc) > budget and tc > 128:
        tc = max(128, _round_up(tc // 2, 128))

    return tb, tc


# ------------------------------- forward -----------------------------------

def prepare_pe_rows(pe_table, seq_len, dtype=jnp.float32):
    """Hoisted out of the forward path: slice, flatten and cast the PE buffer
    once per (seq_len, dtype) instead of on every call."""
    d_model = pe_table.shape[-1]
    return pe_table[:seq_len].reshape(1, seq_len * d_model).astype(dtype)


def positional_encoding_forward(x, pe_row, *, in_place=False):
    """x: (B, S, D) activations; pe_row: (1, S*D) pre-flattened PE row.

    Returns x + pe broadcast over batch (dropout treated as identity).
    Set in_place=True only if x's buffer is donated.
    """
    B, S, D = x.shape
    n = S * D
    assert pe_row.shape == (1, n), (pe_row.shape, (1, n))
    assert pe_row.dtype == x.dtype

    # Free view for contiguous row-major x (XLA copies otherwise - still correct).
    x2 = x.reshape(B, n)

    itemsize = jnp.dtype(x.dtype).itemsize
    tb, tc = _tile_plan(B, n, itemsize)

    # Grid = (column blocks, row blocks): rows are the innermost loop, so the
    # PE block index (which depends only on the column block) is revisited and
    # kept resident across the inner iterations.
    grid = (pl.cdiv(n, tc), pl.cdiv(B, tb))

    kwargs = {}
    if in_place:
        kwargs["input_output_aliases"] = {0: 0}

    out = pl.pallas_call(
        _pe_add_kernel,
        out_shape=jax.ShapeDtypeStruct((B, n), x.dtype),
        grid=grid,
        in_specs=[
            pl.BlockSpec((tb, tc), lambda c, r: (r, c)),   # x tile
            pl.BlockSpec((1, tc), lambda c, r: (0, c)),    # PE tile (row-resident)
        ],
        out_specs=pl.BlockSpec((tb, tc), lambda c, r: (r, c)),
        compiler_params=pltpu.CompilerParams(
            dimension_semantics=("parallel", "parallel"),
            vmem_limit_bytes=32 * 1024 * 1024),
        **kwargs,
    )(x2, pe_row)

    return out.reshape(B, S, D)


# ----------------------- PE buffer (matches PyTorch) -----------------------

def make_positional_encoding(d_model, max_len=5000):
    position = jnp.arange(max_len, dtype=jnp.float32)[:, None]
    div_term = jnp.exp(jnp.arange(0, d_model, 2, dtype=jnp.float32) *
                       (-math.log(10000.0) / d_model))
    pe = jnp.zeros((max_len, d_model), jnp.float32)
    pe = pe.at[:, 0::2].set(jnp.sin(position * div_term))
    pe = pe.at[:, 1::2].set(jnp.cos(position * div_term))
    return pe


# --------------------------------- main ------------------------------------

if __name__ == "__main__":
    B, S, D = 2, 8, 32            # small shapes consistent with the module
    max_len = 5000

    pe = make_positional_encoding(D, max_len=max_len)

    key = jax.random.PRNGKey(0)
    x = jax.random.normal(key, (B, S, D), jnp.float32)

    # Hoisted PE preparation (done once, outside the forward path).
    pe_row = prepare_pe_rows(pe, S, x.dtype)

    fwd = jax.jit(positional_encoding_forward, static_argnames=("in_place",))
    y = fwd(x, pe_row)
    jax.block_until_ready(y)

    # Pure-JAX reference check (dropout == identity at inference).
    ref = x + pe[None, :S, :]
    assert y.shape == (B, S, D), y.shape
    assert jnp.all(jnp.isfinite(y))
    assert jnp.allclose(y, ref, atol=1e-6, rtol=1e-6)

    print("KERNEL_OK")
</pallas_src>

<mosaic_0001>
module attributes {stable_mosaic.version = 11 : i64} {
  func.func @_pe_add_kernel(%arg0: i32, %arg1: i32, %arg2: memref<8x128xf32, #tpu.memory_space<vmem>>, %arg3: memref<1x128xf32, #tpu.memory_space<vmem>>, %arg4: memref<8x128xf32, #tpu.memory_space<vmem>>) attributes {dimension_semantics = [#tpu.dimension_semantics<parallel>, #tpu.dimension_semantics<parallel>], iteration_bounds = array<i64: 2, 1>, scalar_prefetch = 0 : i64, scratch_operands = 0 : i64, tpu.core_type = #tpu.core_type<tc>, window_params = [{transform_indices = @transform_0, window_bounds = array<i64: 8, 128>}, {transform_indices = @transform_1, window_bounds = array<i64: 1, 128>}, {transform_indices = @transform_2, window_bounds = array<i64: 8, 128>}]} {
    %c0 = arith.constant 0 : index
    %c0_0 = arith.constant 0 : index
    %0 = vector.load %arg2[%c0, %c0_0] : memref<8x128xf32, #tpu.memory_space<vmem>>, vector<8x128xf32>
    %c0_1 = arith.constant 0 : index
    %c0_2 = arith.constant 0 : index
    %1 = vector.load %arg3[%c0_1, %c0_2] : memref<1x128xf32, #tpu.memory_space<vmem>>, vector<1x128xf32>
    %2 = vector.broadcast %1 : vector<1x128xf32> to vector<8x128xf32>
    %3 = arith.addf %0, %2 : vector<8x128xf32>
    %c0_3 = arith.constant 0 : index
    %c0_4 = arith.constant 0 : index
    %4 = vector.load %arg4[%c0_3, %c0_4] : memref<8x128xf32, #tpu.memory_space<vmem>>, vector<8x128xf32>
    tpu.vector_store %arg4[%c0_3, %c0_4], %3 {strides = array<i32>} : memref<8x128xf32, #tpu.memory_space<vmem>>, vector<8x128xf32>,
    return
  }
  func.func @transform_0(%arg0: i32, %arg1: i32) -> (i32, i32) {
    %c0_i32 = arith.constant 0 : i32
    return %arg1, %arg0 : i32, i32
  }
  func.func @transform_1(%arg0: i32, %arg1: i32) -> (i32, i32) {
    %c0_i32 = arith.constant 0 : i32
    %c0_i32_0 = arith.constant 0 : i32
    return %c0_i32, %arg0 : i32, i32
  }
  func.func @transform_2(%arg0: i32, %arg1: i32) -> (i32, i32) {
    %c0_i32 = arith.constant 0 : i32
    return %arg1, %arg0 : i32, i32
  }
}

</mosaic_0001>

<bundles_post_ra>
// kernel: positional_encoding_forward.1
= control target key start
LH: loop header
LB: loop body
LE: loop exit
PB: predicated region body
PF: predicated region fallthrough
CT: control target
= control target key end

     0   :  { %s638_s9 = smov 0   ;;  %s640_s10 = smov 0   ;;  %s715_s0 = inlined_call_operand.vmem [shape: f32[2,256], index: 0, kind: input, shape index: {}]   ;;  %s716_s1 = inlined_call_operand.vmem [shape: f32[1,256], index: 1, kind: input, shape index: {}]   ;;  %s717_s2 = inlined_call_operand.vmem [shape: f32[2,256], index: 2, kind: output, shape index: {}]  }
   0x1   :  { %s642_s11 = smov 0   ;;  %s644_s12 = smov 0  }
   0x2   :  { %s646_s13 = smov 0  }
   0x3 LB: > { %s24_s14 = sadd.s32 1, %s609_s12  ;;  %s421_s15 = sadd.s32 4294967295, %s613_s13   ;;  %s613_s13 = sphi %s646_s13, %s12_s13   ;;  %s609_s12 = sphi %s644_s12, %s722_s12   ;;  %s605_s11 = sphi %s642_s11, %s721_s11   ;;  %s601_s10 = sphi %s640_s10, %s720_s10   ;;  %s597_s9 = sphi %s638_s9, %s719_s9  }
   0x4   : > { %p26_p0 = scmp.ge.s32.totalorder %s24_s14, 2  ;;  %p40_p1 = scmp.ne.s32.totalorder %s601_s10, %s597_s9 }
   0x5   : > { %p41_p2 = scmp.eq.s32.totalorder %s613_s13, 0  ;;  %p98_p4 = scmp.eq.s32.totalorder %s421_s15, 1 }
   0x6   : > { %s724_s14 = smov (%p26_p0, %s24_s14), 0  ;;  %s33_s17 = sadd.s32 1, %s601_s10 }
   0x7   : > { %p42_p3 = por %p41_p2, %p40_p1  ;;  %s29_s16 = ssub.s32 %s609_s12, %s724_s14 }
   0x8   : > { %p31_p5 = scmp.eq.s32.totalorder %s29_s16, 0  ;;  %p673_p6 = por %p98_p4, %p40_p1 }
   0x9   : > { %p424_p7 = scmp.ge.s32.totalorder %s613_s13, 2 }
   0xa   : > { %s678_s19 = scalar_select %p31_p5, %s601_s10, %s33_s17  }
   0xb   : > { %120 = sbr.rel (%p424_p7) target bundleno = 29 (0x1d), region = 16 }
  0x10   : > { %123 = sbr.rel (!%p42_p3) target bundleno = 29 (0x1d), region = 20  ;;  %s125_s20 = sand.u32 (%p42_p3), 1, %s601_s10  }
  0x11   : > { %s426_s21 = sshll.u32 (%p42_p3), %s609_s12, 1  ;;  %s425_s22 = sshll.u32 (%p42_p3), %s125_s20, 3 }
  0x12   : > { %s135_s25 = scalar_lea.vmem (%p42_p3), %s715_s0, %s426_s21   ;;  %s127_s26 = scalar_lea.vmem (%p42_p3), [#allocation2], %s425_s22  }
  0x13   : > { %s615_s27 = smov (%p42_p3), 0  }
  0x15 LB: >> { %v154_v0 = vld [vmem:[%s135_s25] sm:$0x3]  ;;  %s148_s27 = sadd.s32 1, %s617_s27   ;;  %s617_s27 = sphi %s615_s27, %s148_s27  }
  0x16   : >> { %155 = vst [vmem:[%s127_s26] sm:$0x3] %v154_v0  ;;  %p147_p8 = scmp.ge.s32.totalorder %s148_s27, 1 }
  0x18   : > { %150 = sbr.rel (!%p147_p8) target bundleno = 21 (0x15), region = 134 }
  0x1d PF: > { %p429_p9 = scmp.ge.s32.totalorder %s613_s13, 1  ;;  %p193_p10 = scmp.lt.s32.totalorder %s613_s13, 3 }
  0x1f   : > { %p194_p11 = pnand %p429_p9, %p193_p10 }
  0x20   : > { %s200_s28 = sand.u32 (!%p194_p11), 1, %s597_s9   ;;  %p226_p12 = scmp.lt.s32.totalorder (!%p194_p11), %s605_s11, 1 }
  0x21   : > { %197 = sbr.rel (%p194_p11) target bundleno = 53 (0x35), region = 58  ;;  %s430_s29 = sshll.u32 (!%p194_p11), %s200_s28, 3 }
  0x22   : > { %s202_s3 = scalar_lea.vmem (!%p194_p11), [#allocation2], %s430_s29  ;;  %s222_s7 = scalar_lea.vmem (!%p194_p11), [#allocation3], %s430_s29  }
  0x26   : > { %s227_s30 = scalar_select %p226_p12, %s605_s11, 1  ;;  %v232_v1 = vld [vmem:[%s202_s3] sm:$0xff] }
  0x27   : > { %s434_s8 = sshll.u32 (%p673_p6), %s605_s11, 1  ;;  %s619_s17 = smov (%p673_p6), 0  }
  0x28   : > { %s228_s6 = scalar_lea.vmem %s716_s1, %s227_s30  ;;  %248 = sbr.rel (!%p673_p6) target bundleno = 53 (0x35), region = 66 }
  0x29   : > { %v432_v2 = vld [vmem:[%s228_s6] ss:$0 sm:$0xff]  ;;  %s256_s16 = scalar_lea.vmem (%p673_p6), %s717_s2, %s434_s8  }
  0x2a   : > { %v240_v3 = vadd.f32 %v432_v2, %v232_v1 }
  0x2c   : > { %241 = vst [vmem:[%s222_s7] sm:$0xff] %v240_v3 }
  0x2d LB: >> { %s269_s17 = sadd.s32 1, %s621_s17   ;;  %s621_s17 = sphi %s619_s17, %s269_s17  }
  0x2e   : >> { %p268_p13 = scmp.ge.s32.totalorder %s269_s17, 1 }
  0x30   : > { %271 = sbr.rel (!%p268_p13) target bundleno = 45 (0x2d), region = 145 }
  0x33   : >> { %v275_v4 = vld [vmem:[%s222_s7] sm:$0x3] }
  0x34   : >> { %276 = vst [vmem:[%s256_s16] sm:$0x3] %v275_v4 }
  0x35 PF: > { %s12_s13 = sadd.s32 1, %s613_s13   ;;  %s719_s9 = smov %s601_s10 }
  0x36   : > { %p9_p0 = scmp.ge.s32.totalorder %s12_s13, 4   ;;  %s720_s10 = smov %s678_s19 }
  0x37   : > { %s721_s11 = smov %s609_s12  ;;  %s722_s12 = smov %s724_s14 }
  0x38   :  { %11 = sbr.rel (!%p9_p0) target bundleno = 3 (0x3), region = 156 }

</bundles_post_ra>
